<compile_context>
chip_gen: v5e
topology: v5e:2x2
jax: 0.10.0
libtpu: 0.0.40
codegen_flags: <defaults>
</compile_context>

<pallas_src>
import jax
import jax.numpy as jnp
from jax.experimental import pallas as pl
from jax.experimental.pallas import tpu as pltpu


def _round_up(x, m):
    return ((x + m - 1) // m) * m


# ----------------------------------------------------------------------------
# Pallas kernel factory (all sizes / rolls are static Python ints)
# ----------------------------------------------------------------------------
def _make_mlm_kernel(tile_n, halo_pad, rolls, stack_length, number_path, proj_h):
    L, NP, H = stack_length, number_path, proj_h

    def kernel(xb_ref, wp_ref, bp_ref, wall_ref, bproj_ref, wout_ref, bout_ref,
               out_ref, sx_ref):
        # ---- frozen predictor (Linear, torch.no_grad) + softmax over halo+tile rows ----
        logits = jnp.dot(xb_ref[...], wp_ref[...],
                         preferred_element_type=jnp.float32) + bp_ref[...]
        m = jnp.max(logits, axis=-1, keepdims=True)
        e = jnp.exp(logits - m)
        # approx reciprocal -> EUP slot; intentional ~1e-3 rel. error (covered by test tolerance).
        inv = pl.reciprocal(jnp.sum(e, axis=-1, keepdims=True), approx=True)
        sx_ref[...] = (e * inv).astype(jnp.bfloat16)          # (halo_pad + tn, P) bf16

        # ---- tile 0 only: halo rows are "before the sequence" -> torch.roll zero-fill ----
        @pl.when(pl.program_id(0) == 0)
        def _():
            sx_ref[0:halo_pad, :] = jnp.zeros((halo_pad, sx_ref.shape[1]), sx_ref.dtype)

        # ---- one MXU matmul against every per-(path, level) projection weight at once ----
        proj = jnp.dot(sx_ref[...], wall_ref[...],
                       preferred_element_type=jnp.float32)    # (halo_pad + tn, NP*L*H) f32

        # ---- per path: sum row-shifted 64-lane-aligned column blocks (sublane shifts only),
        #      + bias + ReLU, then accumulate the per-path output head matmul ----
        acc = None
        for p in range(NP):
            c0 = p * L * H
            y = proj[halo_pad:halo_pad + tile_n, c0:c0 + H]           # level k = 0 (no shift)
            for k in range(1, L):
                s = k * rolls[p]                                       # static row shift
                y = y + proj[halo_pad - s:halo_pad - s + tile_n,
                             c0 + k * H:c0 + (k + 1) * H]
            y = jnp.maximum(y + bproj_ref[p], 0.0)                     # (tn, H) f32
            contrib = jnp.dot(y.astype(jnp.bfloat16), wout_ref[p],
                              preferred_element_type=jnp.float32)      # (tn, 128) f32
            acc = contrib if acc is None else acc + contrib
        out_ref[...] = acc + bout_ref[...]                             # lane-dense unmasked store

    return kernel


# ----------------------------------------------------------------------------
# Wrapper / glue
# ----------------------------------------------------------------------------
def compute_rolls(number_path, path_multiplier, roll_count, roll_start_with_one=True):
    if roll_start_with_one:
        rolls = [path_multiplier ** i * roll_count for i in range(number_path - 1)] + [1]
    else:
        rolls = [path_multiplier ** i * roll_count for i in range(number_path)]
    return [int(r) for r in rolls]


def multilevel_memory_forward(x, params, rolls, stack_length, tile_rows=1024):
    n, d_in = x.shape
    NP, LP, H = params["wproj"].shape
    P = params["wout"].shape[1]
    L = stack_length
    assert LP == L * P
    rolls = tuple(int(r) for r in rolls)

    max_shift = (L - 1) * max(rolls) if L > 1 else 0
    halo_pad = _round_up(max(max_shift, 1), 16)          # bf16 sublane-aligned halo

    # Tile rows: big tiles amortize per-step overhead; keep the grid >= 4 steps when possible
    # (v7x megacore), and keep tn >= max_shift so only tile 0's halo ever reaches before row 0.
    tn = min(_round_up(tile_rows, 8), _round_up(n, 8))
    tn = min(tn, max(_round_up(pl.cdiv(n, 4), 8), 8))
    tn = max(tn, 8, _round_up(max(max_shift, 1), 8))
    n_tiles = pl.cdiv(n, tn)
    n_pad = n_tiles * tn
    p_pad = _round_up(P, 128)                            # lane-dense output head

    # x blocks with the halo baked in: block i = rows [i*tn - halo_pad, i*tn + tn) (zeros before 0).
    # bf16 inputs are an intentional precision choice (frozen predictor runs on the MXU in bf16).
    x_ext = jnp.zeros((halo_pad + n_pad, d_in), jnp.bfloat16)
    x_ext = x_ext.at[halo_pad:halo_pad + n].set(x.astype(jnp.bfloat16))
    idx = jnp.arange(n_tiles)[:, None] * tn + jnp.arange(halo_pad + tn)[None, :]
    x_blocks = jnp.take(x_ext, idx, axis=0)              # (n_tiles, halo_pad + tn, d_in)

    # Fused projection weight: column block (p*L + k) holds Wproj_p[k*P:(k+1)*P, :]  -> (P, NP*L*H)
    wall = jnp.transpose(params["wproj"].reshape(NP, L, P, H), (2, 0, 1, 3))
    wall = wall.reshape(P, NP * L * H).astype(jnp.bfloat16)
    bproj = params["bproj"].astype(jnp.float32)           # (NP, 1, H)

    # Per-path output head, lane-padded to 128: (NP, H, p_pad) bf16 weight / f32 bias.
    wout_p = jnp.zeros((NP, H, p_pad), jnp.float32)
    wout_p = wout_p.at[:, :, :P].set(params["wout"].reshape(NP, H, P)).astype(jnp.bfloat16)
    bout_p = jnp.zeros((1, p_pad), jnp.float32).at[:, :P].set(params["bout"])

    wp_b = params["wp"].astype(jnp.bfloat16)
    bp = params["bp"].astype(jnp.float32)

    kernel = _make_mlm_kernel(tn, halo_pad, rolls, L, NP, H)
    # Constant-weight operands use an index_map that never changes -> no per-step re-DMA.
    grid_spec = pltpu.PrefetchScalarGridSpec(
        num_scalar_prefetch=0,
        grid=(n_tiles,),
        in_specs=[
            pl.BlockSpec((None, halo_pad + tn, d_in), lambda i: (i, 0, 0)),  # x block (+halo)
            pl.BlockSpec((d_in, P), lambda i: (0, 0)),                       # wp (frozen predictor)
            pl.BlockSpec((1, P), lambda i: (0, 0)),                          # bp
            pl.BlockSpec((P, NP * L * H), lambda i: (0, 0)),                 # fused W_all
            pl.BlockSpec((NP, 1, H), lambda i: (0, 0, 0)),                   # per-path bproj
            pl.BlockSpec((NP, H, p_pad), lambda i: (0, 0, 0)),               # per-path padded Wout
            pl.BlockSpec((1, p_pad), lambda i: (0, 0)),                      # padded bout
        ],
        out_specs=pl.BlockSpec((tn, p_pad), lambda i: (i, 0)),
        scratch_shapes=[pltpu.VMEM((halo_pad + tn, P), jnp.bfloat16)],       # softmaxed rows
    )
    out_full = pl.pallas_call(
        kernel,
        out_shape=jax.ShapeDtypeStruct((n_pad, p_pad), jnp.float32),
        grid_spec=grid_spec,
        compiler_params=pltpu.CompilerParams(
            dimension_semantics=("parallel",),            # v7x: both TCs split the row tiles
            vmem_limit_bytes=32 * 1024 * 1024),           # small footprint; fits v7x's 64 MiB
    )(x_blocks, wp_b, bp, wall, bproj, wout_p, bout_p)
    return out_full[:n, :P]


# ----------------------------------------------------------------------------
# Pure-JAX f32 reference mirroring the PyTorch forward literally (roll + zero-fill)
# ----------------------------------------------------------------------------
def reference_forward(x, params, rolls, stack_length):
    sx = jax.nn.softmax(x @ params["wp"] + params["bp"][0], axis=-1)
    n = sx.shape[0]
    ys = []
    for p, r in enumerate(rolls):
        stack_list = [sx]
        for _ in range(stack_length - 1):
            shifted = jnp.roll(stack_list[-1], r, axis=0)
            shifted = shifted.at[:r].set(0.0)
            stack_list.append(shifted)
        stack = jnp.stack(stack_list).transpose(1, 0, 2)        # (N, L, P)
        flat = stack.reshape(n, -1)                             # Flatten
        ys.append(flat @ params["wproj"][p] + params["bproj"][p, 0])
    out = jnp.concatenate(ys, -1)
    out = jnp.maximum(out, 0.0)
    return out @ params["wout"] + params["bout"][0]


if __name__ == "__main__":
    # Small, forward-consistent configuration
    N = 8            # sequence/frame count (roll axis)
    D_IN = 16        # predictor input feature dim
    P = 7            # num_surg_phase
    L = 3            # stack_length
    NP = 3           # number_path
    H = 64           # per-path projection width (64, per the module)
    ROLL_COUNT = 2
    PATH_MULT = 2

    rolls = compute_rolls(NP, PATH_MULT, ROLL_COUNT, roll_start_with_one=True)  # [2, 4, 1]

    # TODO(synk): predictor_model is an arbitrary user-supplied frozen nn.Module; a frozen
    # Linear(D_IN, P) stand-in is used. nn.Dropout is constructed but never applied in forward.
    key = jax.random.PRNGKey(0)
    ks = jax.random.split(key, 8)
    params = {
        "wp":    jax.random.normal(ks[0], (D_IN, P), jnp.float32) * 0.3,
        "bp":    jax.random.normal(ks[1], (1, P), jnp.float32) * 0.1,
        "wproj": jax.random.normal(ks[2], (NP, L * P, H), jnp.float32) * (1.0 / (L * P) ** 0.5),
        "bproj": jax.random.normal(ks[3], (NP, 1, H), jnp.float32) * 0.1,
        "wout":  jax.random.normal(ks[4], (NP * H, P), jnp.float32) * (1.0 / (NP * H) ** 0.5),
        "bout":  jax.random.normal(ks[5], (1, P), jnp.float32) * 0.1,
    }
    x = jax.random.normal(ks[6], (N, D_IN), jnp.float32)

    out = multilevel_memory_forward(x, params, rolls, L)
    out = jax.block_until_ready(out)

    ref = reference_forward(x, params, rolls, L)
    err = float(jnp.max(jnp.abs(out - ref)))
    assert out.shape == (N, P), out.shape
    # bf16 MXU operands with f32 accumulation + approx reciprocal: deliberate ~1e-2-scale tolerance
    # (an all-f32 build of this kernel agrees with the reference to ~1e-5).
    assert err < 2e-2, f"max abs err {err}"
    print("KERNEL_OK")
</pallas_src>

<mosaic_0001>
module attributes {stable_mosaic.version = 11 : i64} {
  func.func @kernel(%arg0: i32, %arg1: memref<1x24x16xbf16, #tpu.memory_space<vmem>>, %arg2: memref<16x7xbf16, #tpu.memory_space<vmem>>, %arg3: memref<1x7xf32, #tpu.memory_space<vmem>>, %arg4: memref<7x576xbf16, #tpu.memory_space<vmem>>, %arg5: memref<3x1x64xf32, #tpu.memory_space<vmem>>, %arg6: memref<3x64x128xbf16, #tpu.memory_space<vmem>>, %arg7: memref<1x128xf32, #tpu.memory_space<vmem>>, %arg8: memref<8x128xf32, #tpu.memory_space<vmem>>, %arg9: memref<24x7xbf16, #tpu.memory_space<vmem>>) attributes {dimension_semantics = [#tpu.dimension_semantics<parallel>], iteration_bounds = array<i64: 1>, scalar_prefetch = 0 : i64, scratch_operands = 1 : i64, tpu.core_type = #tpu.core_type<tc>, window_params = [{transform_indices = @transform_0, window_bounds = array<i64: 1, 24, 16>}, {pipeline_mode = #tpu.pipeline_mode<synchronous>, transform_indices = @transform_1, window_bounds = array<i64: 16, 7>}, {pipeline_mode = #tpu.pipeline_mode<synchronous>, transform_indices = @transform_2, window_bounds = array<i64: 1, 7>}, {pipeline_mode = #tpu.pipeline_mode<synchronous>, transform_indices = @transform_3, window_bounds = array<i64: 7, 576>}, {pipeline_mode = #tpu.pipeline_mode<synchronous>, transform_indices = @transform_4, window_bounds = array<i64: 3, 1, 64>}, {pipeline_mode = #tpu.pipeline_mode<synchronous>, transform_indices = @transform_5, window_bounds = array<i64: 3, 64, 128>}, {pipeline_mode = #tpu.pipeline_mode<synchronous>, transform_indices = @transform_6, window_bounds = array<i64: 1, 128>}, {transform_indices = @transform_7, window_bounds = array<i64: 8, 128>}]} {
    %c0 = arith.constant 0 : index
    %c0_0 = arith.constant 0 : index
    %c0_1 = arith.constant 0 : index
    %0 = vector.load %arg1[%c0, %c0_0, %c0_1] : memref<1x24x16xbf16, #tpu.memory_space<vmem>>, vector<1x24x16xbf16>
    %1 = vector.shape_cast %0 : vector<1x24x16xbf16> to vector<24x16xbf16>
    %c0_2 = arith.constant 0 : index
    %c0_3 = arith.constant 0 : index
    %2 = vector.load %arg2[%c0_2, %c0_3] : memref<16x7xbf16, #tpu.memory_space<vmem>>, vector<16x7xbf16>
    %cst = arith.constant dense<0.000000e+00> : vector<24x7xf32>
    %3 = tpu.matmul %1, %2, %cst {dimension_numbers = #tpu.dot_dimension_numbers<[1], [0], [0], [1], [0, 0, 1, 1], [], []>} : vector<24x16xbf16>, vector<16x7xbf16>, vector<24x7xf32> -> vector<24x7xf32>
    %c0_4 = arith.constant 0 : index
    %c0_5 = arith.constant 0 : index
    %4 = vector.load %arg3[%c0_4, %c0_5] : memref<1x7xf32, #tpu.memory_space<vmem>>, vector<1x7xf32>
    %5 = vector.broadcast %4 : vector<1x7xf32> to vector<24x7xf32>
    %6 = arith.addf %3, %5 : vector<24x7xf32>
    %cst_6 = arith.constant dense<0xFF800000> : vector<24xf32>
    %7 = vector.multi_reduction <maximumf>, %6, %cst_6 [1] : vector<24x7xf32> to vector<24xf32>
    %8 = vector.shape_cast %7 : vector<24xf32> to vector<24x1xf32>
    %9 = vector.broadcast %8 : vector<24x1xf32> to vector<24x7xf32>
    %10 = arith.subf %6, %9 : vector<24x7xf32>
    %11 = math.exp %10 : vector<24x7xf32>
    %cst_7 = arith.constant dense<0.000000e+00> : vector<24xf32>
    %12 = vector.multi_reduction <add>, %11, %cst_7 [1] : vector<24x7xf32> to vector<24xf32>
    %13 = vector.shape_cast %12 : vector<24xf32> to vector<24x1xf32>
    %14 = tpu.reciprocal %13 {approx = true} : vector<24x1xf32> -> vector<24x1xf32>
    %15 = vector.broadcast %14 : vector<24x1xf32> to vector<24x7xf32>
    %16 = arith.mulf %11, %15 : vector<24x7xf32>
    %17 = arith.truncf %16 : vector<24x7xf32> to vector<24x7xbf16>
    %c0_8 = arith.constant 0 : index
    %c0_9 = arith.constant 0 : index
    %18 = vector.load %arg9[%c0_8, %c0_9] : memref<24x7xbf16, #tpu.memory_space<vmem>>, vector<24x7xbf16>
    tpu.vector_store %arg9[%c0_8, %c0_9], %17 {strides = array<i32>} : memref<24x7xbf16, #tpu.memory_space<vmem>>, vector<24x7xbf16>,
    %c0_i32 = arith.constant 0 : i32
    %19 = arith.cmpi eq, %arg0, %c0_i32 : i32
    %20 = arith.extui %19 : i1 to i32
    %c0_i32_10 = arith.constant 0 : i32
    %21 = arith.cmpi ne, %20, %c0_i32_10 : i32
    scf.if %21 {
      %cst_42 = arith.constant 0.000000e+00 : bf16
      %76 = vector.broadcast %cst_42 : bf16 to vector<16x7xbf16>
      %c0_43 = arith.constant 0 : index
      %c0_44 = arith.constant 0 : index
      %77 = vector.load %arg9[%c0_43, %c0_44] : memref<24x7xbf16, #tpu.memory_space<vmem>>, vector<16x7xbf16>
      tpu.vector_store %arg9[%c0_43, %c0_44], %76 {strides = array<i32>} : memref<24x7xbf16, #tpu.memory_space<vmem>>, vector<16x7xbf16>,
    } else {
    }
    %c0_11 = arith.constant 0 : index
    %c0_12 = arith.constant 0 : index
    %22 = vector.load %arg9[%c0_11, %c0_12] : memref<24x7xbf16, #tpu.memory_space<vmem>>, vector<24x7xbf16>
    %c0_13 = arith.constant 0 : index
    %c0_14 = arith.constant 0 : index
    %23 = vector.load %arg4[%c0_13, %c0_14] : memref<7x576xbf16, #tpu.memory_space<vmem>>, vector<7x576xbf16>
    %cst_15 = arith.constant dense<0.000000e+00> : vector<24x576xf32>
    %24 = tpu.matmul %22, %23, %cst_15 {dimension_numbers = #tpu.dot_dimension_numbers<[1], [0], [0], [1], [0, 0, 1, 1], [], []>} : vector<24x7xbf16>, vector<7x576xbf16>, vector<24x576xf32> -> vector<24x576xf32>
    %25 = vector.extract_strided_slice %24 {offsets = [16, 0], sizes = [8, 64], strides = [1, 1]} : vector<24x576xf32> to vector<8x64xf32>
    %26 = vector.extract_strided_slice %24 {offsets = [14, 64], sizes = [8, 64], strides = [1, 1]} : vector<24x576xf32> to vector<8x64xf32>
    %27 = arith.addf %25, %26 : vector<8x64xf32>
    %28 = vector.extract_strided_slice %24 {offsets = [12, 128], sizes = [8, 64], strides = [1, 1]} : vector<24x576xf32> to vector<8x64xf32>
    %29 = arith.addf %27, %28 : vector<8x64xf32>
    %c0_16 = arith.constant 0 : index
    %c0_17 = arith.constant 0 : index
    %c0_18 = arith.constant 0 : index
    %30 = vector.load %arg5[%c0_16, %c0_17, %c0_18] : memref<3x1x64xf32, #tpu.memory_space<vmem>>, vector<1x1x64xf32>
    %31 = vector.shape_cast %30 : vector<1x1x64xf32> to vector<1x64xf32>
    %32 = vector.broadcast %31 : vector<1x64xf32> to vector<8x64xf32>
    %33 = arith.addf %29, %32 : vector<8x64xf32>
    %cst_19 = arith.constant 0.000000e+00 : f32
    %34 = vector.broadcast %cst_19 : f32 to vector<8x64xf32>
    %35 = arith.maximumf %33, %34 : vector<8x64xf32>
    %36 = arith.truncf %35 : vector<8x64xf32> to vector<8x64xbf16>
    %c0_20 = arith.constant 0 : index
    %c0_21 = arith.constant 0 : index
    %c0_22 = arith.constant 0 : index
    %37 = vector.load %arg6[%c0_20, %c0_21, %c0_22] : memref<3x64x128xbf16, #tpu.memory_space<vmem>>, vector<1x64x128xbf16>
    %38 = vector.shape_cast %37 : vector<1x64x128xbf16> to vector<64x128xbf16>
    %cst_23 = arith.constant dense<0.000000e+00> : vector<8x128xf32>
    %39 = tpu.matmul %36, %38, %cst_23 {dimension_numbers = #tpu.dot_dimension_numbers<[1], [0], [0], [1], [0, 0, 1, 1], [], []>} : vector<8x64xbf16>, vector<64x128xbf16>, vector<8x128xf32> -> vector<8x128xf32>
    %40 = vector.extract_strided_slice %24 {offsets = [16, 192], sizes = [8, 64], strides = [1, 1]} : vector<24x576xf32> to vector<8x64xf32>
    %41 = vector.extract_strided_slice %24 {offsets = [12, 256], sizes = [8, 64], strides = [1, 1]} : vector<24x576xf32> to vector<8x64xf32>
    %42 = arith.addf %40, %41 : vector<8x64xf32>
    %43 = vector.extract_strided_slice %24 {offsets = [8, 320], sizes = [8, 64], strides = [1, 1]} : vector<24x576xf32> to vector<8x64xf32>
    %44 = arith.addf %42, %43 : vector<8x64xf32>
    %c1 = arith.constant 1 : index
    %c0_24 = arith.constant 0 : index
    %c0_25 = arith.constant 0 : index
    %45 = vector.load %arg5[%c1, %c0_24, %c0_25] : memref<3x1x64xf32, #tpu.memory_space<vmem>>, vector<1x1x64xf32>
    %46 = vector.shape_cast %45 : vector<1x1x64xf32> to vector<1x64xf32>
    %47 = vector.broadcast %46 : vector<1x64xf32> to vector<8x64xf32>
    %48 = arith.addf %44, %47 : vector<8x64xf32>
    %cst_26 = arith.constant 0.000000e+00 : f32
    %49 = vector.broadcast %cst_26 : f32 to vector<8x64xf32>
    %50 = arith.maximumf %48, %49 : vector<8x64xf32>
    %51 = arith.truncf %50 : vector<8x64xf32> to vector<8x64xbf16>
    %c1_27 = arith.constant 1 : index
    %c0_28 = arith.constant 0 : index
    %c0_29 = arith.constant 0 : index
    %52 = vector.load %arg6[%c1_27, %c0_28, %c0_29] : memref<3x64x128xbf16, #tpu.memory_space<vmem>>, vector<1x64x128xbf16>
    %53 = vector.shape_cast %52 : vector<1x64x128xbf16> to vector<64x128xbf16>
    %cst_30 = arith.constant dense<0.000000e+00> : vector<8x128xf32>
    %54 = tpu.matmul %51, %53, %cst_30 {dimension_numbers = #tpu.dot_dimension_numbers<[1], [0], [0], [1], [0, 0, 1, 1], [], []>} : vector<8x64xbf16>, vector<64x128xbf16>, vector<8x128xf32> -> vector<8x128xf32>
    %55 = arith.addf %39, %54 : vector<8x128xf32>
    %56 = vector.extract_strided_slice %24 {offsets = [16, 384], sizes = [8, 64], strides = [1, 1]} : vector<24x576xf32> to vector<8x64xf32>
    %57 = vector.extract_strided_slice %24 {offsets = [15, 448], sizes = [8, 64], strides = [1, 1]} : vector<24x576xf32> to vector<8x64xf32>
    %58 = arith.addf %56, %57 : vector<8x64xf32>
    %59 = vector.extract_strided_slice %24 {offsets = [14, 512], sizes = [8, 64], strides = [1, 1]} : vector<24x576xf32> to vector<8x64xf32>
    %60 = arith.addf %58, %59 : vector<8x64xf32>
    %c2 = arith.constant 2 : index
    %c0_31 = arith.constant 0 : index
    %c0_32 = arith.constant 0 : index
    %61 = vector.load %arg5[%c2, %c0_31, %c0_32] : memref<3x1x64xf32, #tpu.memory_space<vmem>>, vector<1x1x64xf32>
    %62 = vector.shape_cast %61 : vector<1x1x64xf32> to vector<1x64xf32>
    %63 = vector.broadcast %62 : vector<1x64xf32> to vector<8x64xf32>
    %64 = arith.addf %60, %63 : vector<8x64xf32>
    %cst_33 = arith.constant 0.000000e+00 : f32
    %65 = vector.broadcast %cst_33 : f32 to vector<8x64xf32>
    %66 = arith.maximumf %64, %65 : vector<8x64xf32>
    %67 = arith.truncf %66 : vector<8x64xf32> to vector<8x64xbf16>
    %c2_34 = arith.constant 2 : index
    %c0_35 = arith.constant 0 : index
    %c0_36 = arith.constant 0 : index
    %68 = vector.load %arg6[%c2_34, %c0_35, %c0_36] : memref<3x64x128xbf16, #tpu.memory_space<vmem>>, vector<1x64x128xbf16>
    %69 = vector.shape_cast %68 : vector<1x64x128xbf16> to vector<64x128xbf16>
    %cst_37 = arith.constant dense<0.000000e+00> : vector<8x128xf32>
    %70 = tpu.matmul %67, %69, %cst_37 {dimension_numbers = #tpu.dot_dimension_numbers<[1], [0], [0], [1], [0, 0, 1, 1], [], []>} : vector<8x64xbf16>, vector<64x128xbf16>, vector<8x128xf32> -> vector<8x128xf32>
    %71 = arith.addf %55, %70 : vector<8x128xf32>
    %c0_38 = arith.constant 0 : index
    %c0_39 = arith.constant 0 : index
    %72 = vector.load %arg7[%c0_38, %c0_39] : memref<1x128xf32, #tpu.memory_space<vmem>>, vector<1x128xf32>
    %73 = vector.broadcast %72 : vector<1x128xf32> to vector<8x128xf32>
    %74 = arith.addf %71, %73 : vector<8x128xf32>
    %c0_40 = arith.constant 0 : index
    %c0_41 = arith.constant 0 : index
    %75 = vector.load %arg8[%c0_40, %c0_41] : memref<8x128xf32, #tpu.memory_space<vmem>>, vector<8x128xf32>
    tpu.vector_store %arg8[%c0_40, %c0_41], %74 {strides = array<i32>} : memref<8x128xf32, #tpu.memory_space<vmem>>, vector<8x128xf32>,
    return
  }
  func.func @transform_0(%arg0: i32) -> (i32, i32, i32) {
    %c0_i32 = arith.constant 0 : i32
    %c0_i32_0 = arith.constant 0 : i32
    %c0_i32_1 = arith.constant 0 : i32
    return %arg0, %c0_i32, %c0_i32_0 : i32, i32, i32
  }
  func.func @transform_1(%arg0: i32) -> (i32, i32) {
    %c0_i32 = arith.constant 0 : i32
    %c0_i32_0 = arith.constant 0 : i32
    %c0_i32_1 = arith.constant 0 : i32
    return %c0_i32, %c0_i32_0 : i32, i32
  }
  func.func @transform_2(%arg0: i32) -> (i32, i32) {
    %c0_i32 = arith.constant 0 : i32
    %c0_i32_0 = arith.constant 0 : i32
    %c0_i32_1 = arith.constant 0 : i32
    return %c0_i32, %c0_i32_0 : i32, i32
  }
  func.func @transform_3(%arg0: i32) -> (i32, i32) {
    %c0_i32 = arith.constant 0 : i32
    %c0_i32_0 = arith.constant 0 : i32
    %c0_i32_1 = arith.constant 0 : i32
    return %c0_i32, %c0_i32_0 : i32, i32
  }
  func.func @transform_4(%arg0: i32) -> (i32, i32, i32) {
    %c0_i32 = arith.constant 0 : i32
    %c0_i32_0 = arith.constant 0 : i32
    %c0_i32_1 = arith.constant 0 : i32
    %c0_i32_2 = arith.constant 0 : i32
    return %c0_i32, %c0_i32_0, %c0_i32_1 : i32, i32, i32
  }
  func.func @transform_5(%arg0: i32) -> (i32, i32, i32) {
    %c0_i32 = arith.constant 0 : i32
    %c0_i32_0 = arith.constant 0 : i32
    %c0_i32_1 = arith.constant 0 : i32
    %c0_i32_2 = arith.constant 0 : i32
    return %c0_i32, %c0_i32_0, %c0_i32_1 : i32, i32, i32
  }
  func.func @transform_6(%arg0: i32) -> (i32, i32) {
    %c0_i32 = arith.constant 0 : i32
    %c0_i32_0 = arith.constant 0 : i32
    %c0_i32_1 = arith.constant 0 : i32
    return %c0_i32, %c0_i32_0 : i32, i32
  }
  func.func @transform_7(%arg0: i32) -> (i32, i32) {
    %c0_i32 = arith.constant 0 : i32
    %c0_i32_0 = arith.constant 0 : i32
    return %arg0, %c0_i32 : i32, i32
  }
}

</mosaic_0001>

<bundles_post_ra>
// kernel: tpu_custom_call.1
= control target key start
LH: loop header
LB: loop body
LE: loop exit
PB: predicated region body
PF: predicated region fallthrough
CT: control target
= control target key end

     0   :  { %12 = vsyncpa [#allocation4], 0  ;;  %s812_s0 = inlined_call_operand.vmem [shape: bf16[1,24,16], index: 0, kind: input, shape index: {}]   ;;  %s813_s1 = inlined_call_operand.vmem [shape: bf16[16,7], index: 1, kind: input, shape index: {}]   ;;  %s814_s2 = inlined_call_operand.vmem [shape: f32[1,7], index: 2, kind: input, shape index: {}]   ;;  %s815_s3 = inlined_call_operand.vmem [shape: bf16[7,576], index: 3, kind: input, shape index: {}]   ;;  %s816_s4 = inlined_call_operand.vmem [shape: f32[3,1,64], index: 4, kind: input, shape index: {}]   ;;  %s817_s5 = inlined_call_operand.hbm [shape: bf16[3,64,128], index: 5, kind: input, shape index: {}]   ;;  %s818_s6 = inlined_call_operand.vmem [shape: f32[1,128], index: 6, kind: input, shape index: {}]   ;;  %s819_s7 = inlined_call_operand.hbm [shape: f32[8,128], index: 7, kind: output, shape index: {}]  }
   0x1   :  { %13 = vsyncpa [#allocation5], 0  ;;  %s28_s26 = sshll.u32 %s817_s5, 4  ;;  %s686_s27 = smov [#allocation3]   ;;  %s29_s26 = int_to_ptr.hbm [resolvable:$true] %s28_s26 }
   0x2   :  { %s30_s28 = sshll.u32 %s686_s27, 4  ;;  %s687_s29 = smov 64   ;;  %s31_s28 = int_to_ptr.vmem [resolvable:$true] %s30_s28 }
   0x3   :  { %s688_s30 = smov 4  }
   0x4   :  { %36 = dma.hbm_to_vmem [thread:$0]  %s29_s26, 1536, %s31_s28, [#allocation4], %s687_s29, %s687_s29, %s688_s30  }
   0x5   :  { %682 = dma.done.wait [#allocation4], 1536  }
   0x6   :  { %683 = vsyncadd [#allocation4], 4294965760  ;;  %v597_v0 = vld [vmem:[%s813_s1] sm:$0xff]  ;;  %vm67_vm0 = vcmask 130048   ;;  %v46_v2 = vld [vmem:[%s812_s0 + $0x8] sm:$0xf] }
   0x7   :  { %v596_v1 = vld [vmem:[%s812_s0] sm:$0xff]  ;;  %81 = vmatpush.bf16.msra.mxu0 %v597_v0  ;;  %v58_v3 = vunpack.c.l.b16 %v46_v2  ;;  %vm92_vm1 = vcmask 56320   ;;  %v143_v32 = vld [vmem:[%s815_s3 + $0x8] sm:$0xff]  ;;  %vm172_vm2 = vcmask 1042432   ;;  %vm173_vm3 = vcmask 1043456   ;;  %s691_s25 = smov [#allocation6]  }
   0x8   :  { %v617_v5 = vld [vmem:[%s814_s2] ss:$0 sm:$0xff]  ;;  %v158_v35 = vunpack.c.l.b16 %v143_v32  ;;  %v159_v36 = vunpack.c.h.b16 %v143_v32  ;;  %v689_v38 = vmov 65535   ;;  %vm129_vm4 = vcmask 52224   ;;  %v144_v55 = vld [vmem:[%s815_s3 + $0x10] sm:$0xf] }
   0x9   :  { %v60_v4 = vpack.c.b16 %v58_v3, %v58_v3  ;;  %v142_v31 = vld [vmem:[%s815_s3] sm:$0xff]  ;;  %v174_v39 = vsel %vm172_vm2, 4294967295, %v689_v38  ;;  %v690_v53 = vmov 0   ;;  %v160_v58 = vunpack.c.l.b16 %v144_v55  ;;  %v599_v38 = vld [vmem:[#allocation3] sm:$0xff]  ;;  %s509_s28 = sshll.u32 %s819_s7, 4  ;;  %s510_s28 = int_to_ptr.hbm [resolvable:$true] %s509_s28 }
   0xa   :  { %527 = vmatmul.msk.bf16.vlgmr.msra.gmra.mxu0 %vm67_vm0, %v596_v1  ;;  %v156_v33 = vunpack.c.l.b16 %v142_v31  ;;  %v157_v34 = vunpack.c.h.b16 %v142_v31  ;;  %v175_v41 = vsel %vm173_vm3, %v174_v39, 0  ;;  %v163_v42 = vpack.c.b16 %v158_v35, %v158_v35  ;;  %v602_v35 = vld [vmem:[#allocation3 + $0x18] sm:$0xff] }
   0xb   :  { %v164_v43 = vpack.c.b16 %v159_v36, %v159_v36  ;;  %v165_v60 = vpack.c.b16 %v160_v58, %v160_v58  ;;  %vm278_vm5 = vcmask 1041408   ;;  %v601_v36 = vld [vmem:[#allocation3 + $0x10] sm:$0xff]  ;;  %v606_v39 = vld [vmem:[#allocation3 + $0x38] sm:$0xff]  ;;  %vm423_vm6 = vcmask 1040384  }
   0xc   :  { %v161_v37 = vpack.c.b16 %v156_v33, %v156_v33  ;;  %v162_v40 = vpack.c.b16 %v157_v34, %v157_v34  ;;  %v183_v46 = vand.u32 %v175_v41, %v163_v42  ;;  %v603_v42 = vld [vmem:[#allocation3 + $0x20] sm:$0xff]  ;;  %vm364_vm7 = vcmask 523264  }
   0xd   :  { %v186_v47 = vand.u32 %v175_v41, %v164_v43  ;;  %v189_v61 = vand.u32 %v175_v41, %v165_v60 }
   0xe   :  { %v177_v44 = vand.u32 %v175_v41, %v161_v37  ;;  %v180_v45 = vand.u32 %v175_v41, %v162_v40  ;;  %232 = vmatpush.bf16.msra.mxu3 %v183_v46  ;;  %v600_v37 = vld [vmem:[#allocation3 + $0x8] sm:$0xff]  ;;  %v605_v40 = vld [vmem:[#allocation3 + $0x30] sm:$0xff] }
   0xf   :  { %249 = vmatpush.bf16.msrb.mxu0 %v186_v47  ;;  %v604_v41 = vld [vmem:[#allocation3 + $0x28] sm:$0xff] }
  0x10   :  { %198 = vmatpush.bf16.msra.mxu1 %v177_v44  ;;  %215 = vmatpush.bf16.msra.mxu2 %v180_v45 }
  0x12   :  { %412 = vmatpush.bf16.msrb.mxu3 %v602_v35 }
  0x14   :  { %266 = vmatpush.bf16.msrb.mxu1 %v189_v61  ;;  %372 = vmatpush.bf16.msrb.mxu2 %v606_v39 }
  0x16   :  { %413 = vmatpush.bf16.msrb.mxu3 %v601_v36 }
  0x18   :  { %373 = vmatpush.bf16.msrb.mxu2 %v605_v40 }
  0x1a   :  { %528 = vmatmul.msk.bf16.gmra.mxu0 %vm67_vm0, %v60_v4  ;;  %414 = vmatpush.bf16.msrb.mxu3 %v600_v37 }
  0x1c   :  { %374 = vmatpush.bf16.msrb.mxu2 %v604_v41 }
  0x1e   :  { %415 = vmatpush.bf16.msrb.mxu3 %v599_v38 }
  0x20   :  { %375 = vmatpush.bf16.msrb.mxu2 %v603_v42 }
  0x87   :  { %v83_v6 = vpop.f32.mrf.mxu0 }
  0x88   :  { %v84_v7 = vadd.f32 %v617_v5, %v83_v6 }
  0x8a   :  { %v93_v8 = vsel %vm92_vm1, %v84_v7, -inf }
  0x8b   :  { %94 = vmax.xlane.f32.xlu0 %v93_v8 }
  0x8f   :  { %v85_v9 = vpop.f32.mrf.mxu0 }
  0x90   :  { %v86_v10 = vadd.f32 %v617_v5, %v85_v9 }
  0x92   :  { %v96_v11 = vsel %vm92_vm1, %v86_v10, -inf }
  0x93   :  { %97 = vmax.xlane.f32.xlu0 %v96_v11 }
  0x97   :  { %v88_v12 = vpop.f32.mrf.mxu0 }
  0x98   :  { %v89_v13 = vadd.f32 %v617_v5, %v88_v12  ;;  %v618_v5 = vld [vmem:[%s816_s4 + $0x1] ss:$0 sm:$0xff] }
  0x9a   :  { %v99_v14 = vsel %vm92_vm1, %v89_v13, -inf }
  0x9b   :  { %100 = vmax.xlane.f32.xlu1 %v99_v14 }
  0x9f   :  { %v90_v15 = vpop.f32.mrf.mxu0 }
  0xfe   :  { %v95_v16 = vpop.xlane.xlu0 %94 }
  0xff   :  { %v102_v17 = vsub.f32 %v84_v7, %v95_v16 }
 0x101   :  { %v105_v18 = vmul.f32 1.442695, %v102_v17 }
 0x103   :  { %622 = vpow2.f32 %v105_v18 }
 0x106   :  { %v98_v19 = vpop.xlane.xlu0 %97 }
 0x107   :  { %v103_v20 = vsub.f32 %v86_v10, %v98_v19 }
 0x109   :  { %v623_v21 = vpop.eup %622  ;;  %v107_v22 = vmul.f32 1.442695, %v103_v20 }
 0x10a   :  { %v111_v23 = vsel %vm92_vm1, %v623_v21, 0.0 }
 0x10b   :  { %624 = vpow2.f32 %v107_v22  ;;  %112 = vadd.xlane.f32.xlu1 %v111_v23 }
 0x10e   :  { %v101_v24 = vpop.xlane.xlu1 %100 }
 0x10f   :  { %v104_v25 = vsub.f32 %v89_v13, %v101_v24 }
 0x111   :  { %v625_v26 = vpop.eup %624  ;;  %v109_v27 = vmul.f32 1.442695, %v104_v25 }
 0x112   :  { %v114_v28 = vsel %vm92_vm1, %v625_v26, 0.0 }
 0x113   :  { %626 = vpow2.f32 %v109_v27  ;;  %115 = vadd.xlane.f32.xlu2 %v114_v28 }
 0x119   :  { %v627_v29 = vpop.eup %626 }
 0x11a   :  { %v117_v30 = vsel %vm92_vm1, %v627_v29, 0.0 }
 0x11b   :  { %118 = vadd.xlane.f32.xlu2 %v117_v30 }
 0x124   :  { %322 = vrot.lane.b32.xlu1 %v618_v5, %s687_s29  ;;  %v620_v5 = vld [vmem:[%s816_s4 + $0x2] ss:$0 sm:$0xff] }
 0x17e   :  { %v113_v48 = vpop.xlane.xlu1 %112 }
 0x17f   :  { %628 = vrcp.f32 %v113_v48 }
 0x185   :  { %v629_v49 = vpop.eup %628 }
 0x186   :  { %v123_v50 = vmul.f32 %v629_v49, %v623_v21  ;;  %v116_v51 = vpop.xlane.xlu2 %115 }
 0x187   :  { %630 = vrcp.f32 %v116_v51 }
 0x188   :  { %v126_v52 = vpack.c.bf16 %v123_v50, %v123_v50 }
 0x18a   :  { %130 = vst.msk [vmem:[#allocation2] sm:$0xf] %vm129_vm4, %v126_v52  ;;  %v619_v52 = vld [vmem:[%s816_s4] ss:$0 sm:$0xff]  ;;  %s507_s4 = sshll.u32 %s691_s25, 4  ;;  %s508_s4 = int_to_ptr.vmem [resolvable:$true] %s507_s4 }
 0x18b   :  { %137 = vst.msk [vmem:[#allocation2] sm:$0xf] %vm129_vm4, %v690_v53 }
 0x18d   :  { %v631_v54 = vpop.eup %630 }
 0x18e   :  { %v124_v56 = vmul.f32 %v631_v54, %v625_v26  ;;  %v119_v57 = vpop.xlane.xlu2 %118 }
 0x18f   :  { %632 = vrcp.f32 %v119_v57 }
 0x190   :  { %v127_v59 = vpack.c.bf16 %v124_v56, %v124_v56 }
 0x192   :  { %131 = vst.msk [vmem:[#allocation2 + $0x4] sm:$0xf] %vm129_vm4, %v127_v59 }
 0x193   :  { %138 = vst.msk [vmem:[#allocation2 + $0x4] sm:$0xf] %vm129_vm4, %v690_v53 }
 0x195   :  { %v633_v62 = vpop.eup %632 }
 0x196   :  { %v125_v63 = vmul.f32 %v633_v62, %v627_v29  ;;  %v323_v45 = vpop.permute.xlu1 %322 }
 0x198   :  { %v128_v0 = vpack.c.bf16 %v125_v63, %v125_v63  ;;  %v610_v63 = vld [vmem:[#allocation3 + $0x58] sm:$0xff] }
 0x19a   :  { %132 = vst.msk [vmem:[#allocation2 + $0x8] sm:$0xf] %vm129_vm4, %v128_v0  ;;  %v598_v1 = vld [vmem:[#allocation2] sm:$0xff] }
 0x19b   :  { %533 = vmatmul.msk.bf16.vlgmr.msra.gmra.mxu1 %vm92_vm1, %v598_v1  ;;  %535 = vmatmul.msk.bf16.vlgmr.msra.gmra.mxu2 %vm92_vm1, %v598_v1  ;;  %v609_v0 = vld [vmem:[#allocation3 + $0x50] sm:$0xff] }
 0x19c   :  { %537 = vmatmul.msk.bf16.vlgmr.msra.gmra.mxu3 %vm92_vm1, %v598_v1  ;;  %539 = vmatmul.msk.bf16.vlgmr.msrb.gmra.mxu0 %vm92_vm1, %v598_v1 }
 0x19d   :  { %486 = vmatpush.bf16.msra.mxu2 %v610_v63 }
 0x1a1   :  { %v141_v2 = vld [vmem:[#allocation2 + $0x8] sm:$0xf]  ;;  %487 = vmatpush.bf16.msra.mxu2 %v609_v0 }
 0x1a2   :  { %v150_v3 = vunpack.c.l.b16 %v141_v2  ;;  %v607_v2 = vld [vmem:[#allocation3 + $0x40] sm:$0xff] }
 0x1a4   :  { %v152_v4 = vpack.c.b16 %v150_v3, %v150_v3 }
 0x1ab   :  { %534 = vmatmul.msk.bf16.gmra.mxu1 %vm92_vm1, %v152_v4  ;;  %536 = vmatmul.msk.bf16.gmra.mxu2 %vm92_vm1, %v152_v4 }
 0x1ac   :  { %538 = vmatmul.msk.bf16.gmra.mxu3 %vm92_vm1, %v152_v4  ;;  %540 = vmatmul.msk.bf16.gmra.mxu0 %vm92_vm1, %v152_v4 }
 0x1bb   :  { %541 = vmatmul.msk.bf16.vlgmr.msrb.gmra.mxu1 %vm92_vm1, %v598_v1  ;;  %v608_v1 = vld [vmem:[#allocation3 + $0x48] sm:$0xff] }
 0x1bc   :  { %488 = vmatpush.bf16.msra.mxu2 %v608_v1 }
 0x1c0   :  { %489 = vmatpush.bf16.msra.mxu2 %v607_v2 }
 0x1cb   :  { %542 = vmatmul.msk.bf16.gmra.mxu1 %vm92_vm1, %v152_v4 }
 0x218   :  { %v200_v6 = vpop.f32.mrf.mxu1 }
 0x219   :  { %v251_v7 = vpop.f32.mrf.mxu0 }
 0x21e   :  { %v217_v8 = vpop.f32.mrf.mxu2 }
 0x21f   :  { %v234_v9 = vpop.f32.mrf.mxu3 }
 0x220   :  { %v201_v10 = vpop.f32.mrf.mxu1 }
 0x221   :  { %v784_v11 = vpop.f32.mrf.mxu0  ;;  %v279_v23 = vrot.slane %v201_v10, 6 }
 0x222   :  { %v424_v58 = vrot.slane %v784_v11, 7 }
 0x226   :  { %v218_v12 = vpop.f32.mrf.mxu2 }
 0x227   :  { %v235_v13 = vpop.f32.mrf.mxu3  ;;  %v288_v48 = vrot.slane %v218_v12, 4 }
 0x228   :  { %v204_v14 = vpop.f32.mrf.mxu1  ;;  %v310_v18 = vrot.slane %v235_v13, 4 }
 0x229   :  { %v786_v15 = vpop.f32.mrf.mxu0  ;;  %v280_v24 = vrot.slane %v204_v14, 6 }
 0x22a   :  { %v425_v59 = vrot.slane %v786_v15, 7 }
 0x22b   :  { %v281_v28 = vsel %vm278_vm5, %v279_v23, %v280_v24 }
 0x22c   :  { %v426_v62 = vsel %vm423_vm6, %v424_v58, %v425_v59 }
 0x22e   :  { %v221_v16 = vpop.f32.mrf.mxu2 }
 0x22f   :  { %v238_v17 = vpop.f32.mrf.mxu3  ;;  %v289_v49 = vrot.slane %v221_v16, 4 }
 0x230   :  { %v311_v19 = vrot.slane %v238_v17, 4  ;;  %v206_v20 = vpop.f32.mrf.mxu1  ;;  %v621_v17 = vld [vmem:[%s818_s6] ss:$0 sm:$0xff] }
 0x231   :  { %v257_v21 = vpop.f32.mrf.mxu0  ;;  %v290_v55 = vsel %vm173_vm3, %v288_v48, %v289_v49 }
 0x232   :  { %v312_v22 = vsel %vm173_vm3, %v310_v18, %v311_v19 }
 0x233   :  { %313 = vrot.lane.b32.xlu0 %v312_v22, %s687_s29 }
 0x236   :  { %v223_v25 = vpop.f32.mrf.mxu2 }
 0x237   :  { %v240_v26 = vpop.f32.mrf.mxu3 }
 0x238   :  { %v268_v27 = vpop.f32.mrf.mxu1 }
 0x23b   :  { %282 = vrot.lane.b32.xlu0 %v281_v28, %s687_s29 }
 0x240   :  { %v269_v29 = vpop.f32.mrf.mxu1 }
 0x241   :  { %v433_v30 = vrot.slane %v269_v29, 6 }
 0x248   :  { %v272_v31 = vpop.f32.mrf.mxu1 }
 0x249   :  { %v434_v32 = vrot.slane %v272_v31, 6 }
 0x24b   :  { %v435_v33 = vsel %vm278_vm5, %v433_v30, %v434_v32 }
 0x250   :  { %v274_v34 = vpop.f32.mrf.mxu1 }
 0x2a5   :  { %v314_v43 = vpop.permute.xlu0 %313 }
 0x2a6   :  { %v316_v44 = vadd.f32 %v314_v43, %v221_v16 }
 0x2a8   :  { %v317_v46 = vadd.f32 %v316_v44, %v235_v13 }
 0x2aa   :  { %v325_v47 = vadd.f32 %v323_v45, %v317_v46 }
 0x2ac   :  { %v326_v50 = vmax.f32 %v325_v47, 0.0 }
 0x2ad   :  { %v283_v51 = vpop.permute.xlu0 %282 }
 0x2ae   :  { %v285_v53 = vadd.f32 %v283_v51, %v204_v14  ;;  %v327_v54 = vpack.c.bf16 %v326_v50, %v326_v50 }
 0x2b0   :  { %v292_v56 = vadd.f32 %v290_v55, %v285_v53  ;;  %338 = vrot.lane.b32.xlu2 %v327_v54, %s687_s29 }
 0x2b2   :  { %v297_v57 = vadd.f32 %v619_v52, %v292_v56 }
 0x2b4   :  { %v298_v60 = vmax.f32 %v297_v57, 0.0 }
 0x2b6   :  { %v299_v61 = vpack.c.bf16 %v298_v60, %v298_v60 }
 0x2b8   :  { %427 = vrot.lane.b32.xlu2 %v426_v62, %s687_s29  ;;  %577 = vmatmul.msk.bf16.vlgmr.msrb.gmra.mxu3 %vm364_vm7, %v299_v61 }
 0x30a   :  { %v339_v3 = vpop.permute.xlu2 %338 }
 0x30b   :  { %560 = vmatmul.msk.bf16.vlgmr.msrb.gmra.mxu2 %vm364_vm7, %v339_v3 }
 0x312   :  { %v428_v4 = vpop.permute.xlu2 %427 }
 0x313   :  { %v430_v6 = vadd.f32 %v428_v4, %v786_v15 }
 0x315   :  { %v437_v7 = vadd.f32 %v435_v33, %v430_v6 }
 0x317   :  { %v443_v8 = vadd.f32 %v620_v5, %v437_v7 }
 0x319   :  { %v444_v9 = vmax.f32 %v443_v8, 0.0 }
 0x31b   :  { %v445_v10 = vpack.c.bf16 %v444_v9, %v444_v9 }
 0x31d   :  { %595 = vmatmul.msk.bf16.vlgmr.msra.gmra.mxu2 %vm364_vm7, %v445_v10 }
 0x33b   :  { %v417_v11 = vpop.f32.mrf.mxu3 }
 0x343   :  { %v419_v12 = vpop.f32.mrf.mxu3 }
 0x38e   :  { %v377_v13 = vpop.f32.mrf.mxu2 }
 0x38f   :  { %v418_v16 = vadd.f32 %v417_v11, %v377_v13 }
 0x396   :  { %v379_v14 = vpop.f32.mrf.mxu2 }
 0x3a0   :  { %v491_v18 = vpop.f32.mrf.mxu2 }
 0x3a1   :  { %v495_v15 = vadd.f32 %v491_v18, %v418_v16 }
 0x3a3   :  { %v500_v19 = vadd.f32 %v621_v17, %v495_v15 }
 0x3a5   :  { %501 = vst [vmem:[#allocation6] sm:$0xff] %v500_v19 }
 0x3a6   :  { %512 = dma.vmem_to_hbm [thread:$0]  %s508_s4, 128, %s510_s28, [#allocation5]  }
 0x3a8   :  { %v493_v20 = vpop.f32.mrf.mxu2 }
 0x3a9   :  { %684 = dma.done.wait [#allocation5], 128  }
 0x3aa   :  { %685 = vsyncadd [#allocation5], 4294967168 }
 0x3ab   :  { %517 = vsyncpa [#allocation4], 1 }
 0x3ac   :  { %518 = vsyncpa [#allocation5], 1 }

</bundles_post_ra>
